<compile_context>
chip_gen: v6e
topology: v6e:2x2x1
jax: 0.10.0
libtpu: 0.0.40
codegen_flags: <defaults>
</compile_context>

<pallas_src>
import functools

import jax
import jax.numpy as jnp
from jax.experimental import pallas as pl
from jax.experimental.pallas import tpu as pltpu


# ----------------------------------------------------------------------------
# Kernels
# ----------------------------------------------------------------------------

def _make_resident_kernel(T, hw_tile, hw_valid, needs_mask):
    """Fast path: full (1, C2, HW_pad) output block resident in VMEM across T."""
    inv_hw = 1.0 / float(hw_valid)

    def kernel(x_ref, w_ref, bias_ref, w1t_ref, w2_ref, o_ref, sum_ref):
        # x_ref   : (1, C1, hw_tile)   native dtype (streamed HW tile)
        # w_ref   : (C2, C1)           bf16  conv weight with BN scale folded in
        # bias_ref: (C2, 1)            f32   folded BN bias
        # w1t_ref : (C2, Cmid)         f32   fc1_w.T
        # w2_ref  : (C2, Cmid)         f32   fc2_w
        # o_ref   : (1, C2, HW_pad)    bf16  resident across the HW-tile grid axis
        # sum_ref : (C2, 1)            f32   running per-channel sum (scratch)
        t = pl.program_id(1)

        @pl.when(t == 0)
        def _():
            sum_ref[...] = jnp.zeros_like(sum_ref)

        # 1x1 conv (+ folded BN scale) as a channels-first MXU matmul. The cast of
        # the streamed x tile to bf16 happens in VMEM (hidden under the DMA).
        xt = x_ref[0].astype(jnp.bfloat16)                               # (C1, hw_tile)
        y = jnp.dot(w_ref[...], xt, preferred_element_type=jnp.float32)  # (C2, hw_tile)
        y = y + bias_ref[...]                                            # folded BN bias
        y = y * jax.nn.sigmoid(y)                                        # SiLU

        if needs_mask:
            # Padded lanes would otherwise evaluate to SiLU(bias) != 0 and pollute the
            # global-average-pool sum; zero them (they are sliced off after the call).
            lane = jax.lax.broadcasted_iota(jnp.int32, y.shape, 1)
            y = jnp.where(t * hw_tile + lane < hw_valid, y, 0.0)

        # Accumulate per-channel sums in f32 for the global average pool.
        sum_ref[...] += jnp.sum(y, axis=1, keepdims=True)

        start = pl.multiple_of(t * hw_tile, 128)

        @pl.when(t < T - 1)
        def _():
            o_ref[0, :, pl.ds(start, hw_tile)] = y.astype(o_ref.dtype)

        @pl.when(t == T - 1)
        def _():
            # Tiny CA attention: avg-pool -> fc1 -> relu -> fc2 -> sigmoid (no biases,
            # matching the PyTorch spec's bias=False Linears). Done once per image.
            avg = sum_ref[...] * inv_hw                                  # (C2, 1)
            h = jnp.maximum(
                jnp.sum(w1t_ref[...] * avg, axis=0, keepdims=True), 0.0)  # (1, Cmid)
            att = jax.nn.sigmoid(
                jnp.sum(w2_ref[...] * h, axis=1, keepdims=True))          # (C2, 1)
            # Store the last tile already scaled, so only the first T-1 tiles need the
            # read-modify-write rescale of the resident block.
            o_ref[0, :, pl.ds(start, hw_tile)] = (y * att).astype(o_ref.dtype)
            if T > 1:
                prev = (T - 1) * hw_tile
                blk = o_ref[0, :, pl.ds(0, prev)].astype(jnp.float32)
                o_ref[0, :, pl.ds(0, prev)] = (blk * att).astype(o_ref.dtype)

    return kernel


def _make_pass1_kernel(hw_tile, hw_valid, needs_mask):
    """Fallback pass 1: conv + BN + SiLU, write unscaled bf16 tiles + channel sums."""

    def kernel(x_ref, w_ref, bias_ref, y_ref, sum_ref):
        # y_ref   : (1, C2, hw_tile)  bf16   HW-tiled (not resident)
        # sum_ref : (1, C2, 1)        f32    per-image accumulator (resident across T)
        t = pl.program_id(1)
        xt = x_ref[0].astype(jnp.bfloat16)
        y = jnp.dot(w_ref[...], xt, preferred_element_type=jnp.float32)
        y = y + bias_ref[...]
        y = y * jax.nn.sigmoid(y)
        if needs_mask:
            lane = jax.lax.broadcasted_iota(jnp.int32, y.shape, 1)
            y = jnp.where(t * hw_tile + lane < hw_valid, y, 0.0)
        y_ref[0] = y.astype(y_ref.dtype)
        tile_sum = jnp.sum(y, axis=1, keepdims=True)                     # (C2, 1)

        @pl.when(t == 0)
        def _():
            sum_ref[0] = tile_sum

        @pl.when(t > 0)
        def _():
            sum_ref[0] = sum_ref[0] + tile_sum

    return kernel


def _rescale_kernel(y_ref, att_ref, o_ref):
    """Fallback pass 2: out = y * att, streamed tile by tile (lane-dense)."""
    o_ref[0] = (y_ref[0].astype(jnp.float32) * att_ref[0]).astype(o_ref.dtype)


# ----------------------------------------------------------------------------
# Wrapper
# ----------------------------------------------------------------------------

def _round_up(x, m):
    return ((x + m - 1) // m) * m


def _pick_hw_tile(hw_pad, max_tile):
    """Largest divisor of hw_pad that is a multiple of 128 and <= max_tile."""
    cap = min(hw_pad, max(128, max_tile - max_tile % 128))
    for cand in range(cap - cap % 128, 127, -128):
        if hw_pad % cand == 0:
            return cand
    return hw_pad  # hw_pad is itself a multiple of 128


def convca_pallas(x_nchw, conv_w, bn_gamma, bn_beta, bn_mean, bn_var,
                  fc1_w, fc2_w, eps=1e-5, hw_tile=None, force_two_pass=False):
    """x_nchw: (N, C1, H, W). conv_w: (C2, C1, 1, 1). fc1_w: (Cmid, C2).
    fc2_w: (C2, Cmid). Returns (N, C2, H, W) in bf16, matching the PyTorch module
    forward (eval mode, k=1/s=1/g=1/d=1 Conv)."""
    N, C1, H, W = x_nchw.shape
    C2 = conv_w.shape[0]
    Cmid = fc1_w.shape[0]
    HW = H * W
    HW_pad = _round_up(HW, 128)
    needs_mask = HW_pad != HW

    # Channels-first: NCHW -> (N, C1, HW). Pure reshape; keep the native dtype
    # (the bf16 cast happens inside the kernel, not as an extra HBM pass).
    x = x_nchw.reshape(N, C1, HW)
    if needs_mask:
        x = jnp.pad(x, ((0, 0), (0, 0), (0, HW_pad - HW)))

    # Fold BatchNorm (eval) into the conv weight / a per-channel bias.
    scale = bn_gamma / jnp.sqrt(bn_var + eps)                            # (C2,)
    w_folded = (conv_w.reshape(C2, C1) * scale[:, None]).astype(jnp.bfloat16)
    bias = (bn_beta - bn_mean * scale).reshape(C2, 1).astype(jnp.float32)
    w1t = fc1_w.T.astype(jnp.float32)                                    # (C2, Cmid)
    w2 = fc2_w.astype(jnp.float32)                                       # (C2, Cmid)

    out_dtype = jnp.bfloat16
    x_itemsize = jnp.dtype(x.dtype).itemsize
    out_block_bytes = C2 * HW_pad * jnp.dtype(out_dtype).itemsize
    weight_bytes = C2 * C1 * 2 + C2 * 4 + 2 * C2 * Cmid * 4
    slack = 2 << 20

    # VMEM-size gate for the resident-output fast path (output block is effectively
    # double-buffered across the batch axis).
    try:
        vmem_cap = int(pltpu.get_tpu_info().vmem_capacity_bytes)
    except Exception:
        vmem_cap = 64 << 20                     # conservative (v7x) default
    budget = int(0.80 * vmem_cap)
    resident_fixed = 2 * out_block_bytes + weight_bytes + slack
    min_x_tile_bytes = 2 * C1 * 128 * x_itemsize
    use_resident = (not force_two_pass) and (resident_fixed + min_x_tile_bytes <= budget)

    if hw_tile is None:
        if use_resident:
            # Spend the VMEM left after the resident block on a bigger x tile.
            x_tile_budget = max(budget - resident_fixed, min_x_tile_bytes) // 2
            max_tile = x_tile_budget // max(C1 * x_itemsize, 1)
        else:
            max_tile = 4096
        max_tile = max(128, min(int(max_tile), 8192, HW_pad))
        hw_tile = _pick_hw_tile(HW_pad, max_tile)
    if HW_pad % hw_tile != 0 or hw_tile % 128 != 0:
        raise ValueError(f"hw_tile={hw_tile} must be a multiple of 128 dividing {HW_pad}")
    T = HW_pad // hw_tile

    flops = 2 * N * C2 * C1 * HW_pad
    transcendentals = N * C2 * HW_pad            # sigmoid inside SiLU dominates
    bytes_accessed = (N * C1 * HW_pad * x_itemsize + weight_bytes + N * out_block_bytes)
    cost = pl.CostEstimate(flops=flops, transcendentals=transcendentals,
                           bytes_accessed=bytes_accessed)

    if use_resident:
        vmem_limit = int(min(
            max(resident_fixed + 2 * C1 * hw_tile * x_itemsize + slack, 16 << 20),
            0.9 * vmem_cap))
        kernel = _make_resident_kernel(T, hw_tile, HW, needs_mask)
        out = pl.pallas_call(
            kernel,
            out_shape=jax.ShapeDtypeStruct((N, C2, HW_pad), out_dtype),
            grid=(N, T),
            in_specs=[
                pl.BlockSpec((1, C1, hw_tile), lambda b, t: (b, 0, t)),
                pl.BlockSpec((C2, C1), lambda b, t: (0, 0)),
                pl.BlockSpec((C2, 1), lambda b, t: (0, 0)),
                pl.BlockSpec((C2, Cmid), lambda b, t: (0, 0)),
                pl.BlockSpec((C2, Cmid), lambda b, t: (0, 0)),
            ],
            # Output block is resident across the HW-tile axis (accumulator pattern).
            out_specs=pl.BlockSpec((1, C2, HW_pad), lambda b, t: (b, 0, 0)),
            scratch_shapes=[pltpu.VMEM((C2, 1), jnp.float32)],
            compiler_params=pltpu.CompilerParams(
                dimension_semantics=("parallel", "arbitrary"),
                vmem_limit_bytes=vmem_limit),
            cost_estimate=cost,
        )(x, w_folded, bias, w1t, w2)
    else:
        # Two-pass fallback: conv+SiLU tiles + sums, tiny CA math in JAX, tiled rescale.
        tile_bytes = (2 * C1 * hw_tile * x_itemsize + 4 * C2 * hw_tile * 2
                      + weight_bytes + slack)
        vmem_limit = int(min(max(tile_bytes, 16 << 20), 0.9 * vmem_cap))
        pass1 = _make_pass1_kernel(hw_tile, HW, needs_mask)
        y_pad, sums = pl.pallas_call(
            pass1,
            out_shape=(jax.ShapeDtypeStruct((N, C2, HW_pad), out_dtype),
                       jax.ShapeDtypeStruct((N, C2, 1), jnp.float32)),
            grid=(N, T),
            in_specs=[
                pl.BlockSpec((1, C1, hw_tile), lambda b, t: (b, 0, t)),
                pl.BlockSpec((C2, C1), lambda b, t: (0, 0)),
                pl.BlockSpec((C2, 1), lambda b, t: (0, 0)),
            ],
            out_specs=(pl.BlockSpec((1, C2, hw_tile), lambda b, t: (b, 0, t)),
                       pl.BlockSpec((1, C2, 1), lambda b, t: (b, 0, 0))),
            compiler_params=pltpu.CompilerParams(
                dimension_semantics=("parallel", "arbitrary"),
                vmem_limit_bytes=vmem_limit),
            cost_estimate=cost,
        )(x, w_folded, bias)

        avg = sums[:, :, 0] * (1.0 / HW)                                  # (N, C2)
        h = jnp.maximum(avg @ w1t, 0.0)                                   # (N, Cmid)
        att = jax.nn.sigmoid(h @ w2.T)                                    # (N, C2)
        att3 = att[:, :, None].astype(jnp.float32)                        # (N, C2, 1)

        out = pl.pallas_call(
            _rescale_kernel,
            out_shape=jax.ShapeDtypeStruct((N, C2, HW_pad), out_dtype),
            grid=(N, T),
            in_specs=[pl.BlockSpec((1, C2, hw_tile), lambda b, t: (b, 0, t)),
                      pl.BlockSpec((1, C2, 1), lambda b, t: (b, 0, 0))],
            out_specs=pl.BlockSpec((1, C2, hw_tile), lambda b, t: (b, 0, t)),
            compiler_params=pltpu.CompilerParams(
                dimension_semantics=("parallel", "parallel"),
                vmem_limit_bytes=vmem_limit),
        )(y_pad, att3)

    if needs_mask:
        out = out[:, :, :HW]
    return out.reshape(N, C2, H, W)


# ----------------------------------------------------------------------------
# Pure-JAX reference (mirrors the PyTorch forward in eval mode, same numerics)
# ----------------------------------------------------------------------------

def convca_reference(x_nchw, conv_w, bn_gamma, bn_beta, bn_mean, bn_var,
                     fc1_w, fc2_w, eps=1e-5):
    N, C1, H, W = x_nchw.shape
    C2 = conv_w.shape[0]
    HW = H * W
    scale = bn_gamma / jnp.sqrt(bn_var + eps)
    w_folded = (conv_w.reshape(C2, C1) * scale[:, None]).astype(jnp.bfloat16)
    bias = bn_beta - bn_mean * scale
    xb = x_nchw.reshape(N, C1, HW).astype(jnp.bfloat16)
    y = jnp.einsum('oc,ncp->nop', w_folded, xb,
                   preferred_element_type=jnp.float32)                    # (N, C2, HW)
    y = y + bias[None, :, None]
    y = y * jax.nn.sigmoid(y)                                             # SiLU
    avg = jnp.mean(y, axis=2)                                             # (N, C2)
    h = jnp.maximum(avg @ fc1_w.T, 0.0)
    att = jax.nn.sigmoid(h @ fc2_w.T)                                     # (N, C2)
    return (y * att[:, :, None]).reshape(N, C2, H, W)


# ----------------------------------------------------------------------------
# Self-test
# ----------------------------------------------------------------------------

def _run_case(name, N, C1, C2, H, W, reduction=1, hw_tile=None, force_two_pass=False):
    Cmid = max(C2 // reduction, 1)
    key = jax.random.PRNGKey(0)
    k_x, k_conv, k_fc1, k_fc2, k_bn = jax.random.split(key, 5)

    x = jax.random.normal(k_x, (N, C1, H, W), dtype=jnp.float32)
    conv_w = jax.random.normal(k_conv, (C2, C1, 1, 1), dtype=jnp.float32) * 0.2
    fc1_w = jax.random.normal(k_fc1, (Cmid, C2), dtype=jnp.float32) * 0.2
    fc2_w = jax.random.normal(k_fc2, (C2, Cmid), dtype=jnp.float32) * 0.2
    bn_gamma = 1.0 + 0.1 * jax.random.normal(k_bn, (C2,), dtype=jnp.float32)
    bn_beta = jnp.linspace(-0.1, 0.1, C2, dtype=jnp.float32)
    bn_mean = jnp.linspace(-0.05, 0.05, C2, dtype=jnp.float32)
    bn_var = jnp.full((C2,), 0.9, dtype=jnp.float32)

    out = convca_pallas(x, conv_w, bn_gamma, bn_beta, bn_mean, bn_var,
                        fc1_w, fc2_w, hw_tile=hw_tile, force_two_pass=force_two_pass)
    out = jax.block_until_ready(out)

    ref = convca_reference(x, conv_w, bn_gamma, bn_beta, bn_mean, bn_var, fc1_w, fc2_w)
    ref = jax.block_until_ready(ref)

    assert out.shape == (N, C2, H, W), f"{name}: bad shape {out.shape}"
    out_f32 = out.astype(jnp.float32)
    err = float(jnp.max(jnp.abs(out_f32 - ref)))
    ok = bool(jnp.allclose(out_f32, ref, atol=2e-2, rtol=2e-2))
    assert ok, f"{name}: max abs err {err}"


if __name__ == "__main__":
    # 1) Resident fast path, HW=256 tiled as 2x128 (exercises stream/accumulate +
    #    last-tile prescale + partial rescale of the resident block).
    _run_case("resident_tiled", N=2, C1=4, C2=8, H=16, W=16, hw_tile=128)
    # 2) Resident path with non-128-multiple HW (100 -> padded to 128, lane masking).
    _run_case("resident_padded", N=2, C1=4, C2=8, H=10, W=10)
    # 3) Size-gated two-pass fallback path (forced at small shapes to exercise it).
    _run_case("two_pass", N=2, C1=4, C2=8, H=16, W=16, hw_tile=128, force_two_pass=True)

    print("KERNEL_OK")
</pallas_src>

<mosaic_0001>
module attributes {stable_mosaic.version = 11 : i64} {
  func.func @kernel(%arg0: i32, %arg1: i32, %arg2: memref<1x4x128xf32, #tpu.memory_space<vmem>>, %arg3: memref<8x4xbf16, #tpu.memory_space<vmem>>, %arg4: memref<8x1xf32, #tpu.memory_space<vmem>>, %arg5: memref<8x8xf32, #tpu.memory_space<vmem>>, %arg6: memref<8x8xf32, #tpu.memory_space<vmem>>, %arg7: memref<1x8x256xbf16, #tpu.memory_space<vmem>>, %arg8: memref<8x1xf32, #tpu.memory_space<vmem>>) attributes {dimension_semantics = [#tpu.dimension_semantics<parallel>, #tpu.dimension_semantics<arbitrary>], iteration_bounds = array<i64: 2, 2>, scalar_prefetch = 0 : i64, scratch_operands = 1 : i64, tpu.core_type = #tpu.core_type<tc>, window_params = [{transform_indices = @transform_0, window_bounds = array<i64: 1, 4, 128>}, {pipeline_mode = #tpu.pipeline_mode<synchronous>, transform_indices = @transform_1, window_bounds = array<i64: 8, 4>}, {pipeline_mode = #tpu.pipeline_mode<synchronous>, transform_indices = @transform_2, window_bounds = array<i64: 8, 1>}, {pipeline_mode = #tpu.pipeline_mode<synchronous>, transform_indices = @transform_3, window_bounds = array<i64: 8, 8>}, {pipeline_mode = #tpu.pipeline_mode<synchronous>, transform_indices = @transform_4, window_bounds = array<i64: 8, 8>}, {transform_indices = @transform_5, window_bounds = array<i64: 1, 8, 256>}]} {
    %c0_i32 = arith.constant 0 : i32
    %0 = arith.cmpi eq, %arg1, %c0_i32 : i32
    %1 = arith.extui %0 : i1 to i32
    %c0_i32_0 = arith.constant 0 : i32
    %2 = arith.cmpi ne, %1, %c0_i32_0 : i32
    scf.if %2 {
      %cst_16 = arith.constant 0.000000e+00 : f32
      %30 = vector.broadcast %cst_16 : f32 to vector<8x1xf32>
      %c0_17 = arith.constant 0 : index
      %c0_18 = arith.constant 0 : index
      %31 = vector.load %arg8[%c0_17, %c0_18] : memref<8x1xf32, #tpu.memory_space<vmem>>, vector<8x1xf32>
      tpu.vector_store %arg8[%c0_17, %c0_18], %30 {strides = array<i32>} : memref<8x1xf32, #tpu.memory_space<vmem>>, vector<8x1xf32>,
    } else {
    }
    %c0 = arith.constant 0 : index
    %c0_1 = arith.constant 0 : index
    %c0_2 = arith.constant 0 : index
    %3 = vector.load %arg2[%c0, %c0_1, %c0_2] : memref<1x4x128xf32, #tpu.memory_space<vmem>>, vector<1x4x128xf32>
    %4 = vector.shape_cast %3 : vector<1x4x128xf32> to vector<4x128xf32>
    %5 = arith.truncf %4 : vector<4x128xf32> to vector<4x128xbf16>
    %c0_3 = arith.constant 0 : index
    %c0_4 = arith.constant 0 : index
    %6 = vector.load %arg3[%c0_3, %c0_4] : memref<8x4xbf16, #tpu.memory_space<vmem>>, vector<8x4xbf16>
    %cst = arith.constant dense<0.000000e+00> : vector<8x128xf32>
    %7 = tpu.matmul %6, %5, %cst {dimension_numbers = #tpu.dot_dimension_numbers<[1], [0], [0], [1], [0, 0, 1, 1], [], []>} : vector<8x4xbf16>, vector<4x128xbf16>, vector<8x128xf32> -> vector<8x128xf32>
    %c0_5 = arith.constant 0 : index
    %c0_6 = arith.constant 0 : index
    %8 = vector.load %arg4[%c0_5, %c0_6] : memref<8x1xf32, #tpu.memory_space<vmem>>, vector<8x1xf32>
    %9 = vector.broadcast %8 : vector<8x1xf32> to vector<8x128xf32>
    %10 = arith.addf %7, %9 : vector<8x128xf32>
    %11 = arith.negf %10 : vector<8x128xf32>
    %12 = math.exp %11 : vector<8x128xf32>
    %cst_7 = arith.constant 1.000000e+00 : f32
    %13 = vector.broadcast %cst_7 : f32 to vector<8x128xf32>
    %14 = arith.addf %13, %12 : vector<8x128xf32>
    %15 = arith.divf %13, %14 : vector<8x128xf32>
    %16 = arith.mulf %10, %15 : vector<8x128xf32>
    %c0_8 = arith.constant 0 : index
    %c0_9 = arith.constant 0 : index
    %17 = vector.load %arg8[%c0_8, %c0_9] : memref<8x1xf32, #tpu.memory_space<vmem>>, vector<8x1xf32>
    %cst_10 = arith.constant dense<0.000000e+00> : vector<8xf32>
    %18 = vector.multi_reduction <add>, %16, %cst_10 [1] : vector<8x128xf32> to vector<8xf32>
    %19 = vector.shape_cast %18 : vector<8xf32> to vector<8x1xf32>
    %20 = arith.addf %17, %19 : vector<8x1xf32>
    %c0_11 = arith.constant 0 : index
    %c0_12 = arith.constant 0 : index
    %21 = vector.load %arg8[%c0_11, %c0_12] : memref<8x1xf32, #tpu.memory_space<vmem>>, vector<8x1xf32>
    tpu.vector_store %arg8[%c0_11, %c0_12], %20 {strides = array<i32>} : memref<8x1xf32, #tpu.memory_space<vmem>>, vector<8x1xf32>,
    %c128_i32 = arith.constant 128 : i32
    %22 = arith.muli %arg1, %c128_i32 : i32
    %23 = tpu.assume_multiple %22, 128 : i32
    %c1_i32 = arith.constant 1 : i32
    %24 = arith.cmpi slt, %arg1, %c1_i32 : i32
    %25 = arith.extui %24 : i1 to i32
    %c0_i32_13 = arith.constant 0 : i32
    %26 = arith.cmpi ne, %25, %c0_i32_13 : i32
    scf.if %26 {
      %30 = arith.truncf %16 : vector<8x128xf32> to vector<8x128xbf16>
      %c0_16 = arith.constant 0 : index
      %c0_17 = arith.constant 0 : index
      %31 = arith.index_cast %23 : i32 to index
      %32 = vector.load %arg7[%c0_16, %c0_17, %31] : memref<1x8x256xbf16, #tpu.memory_space<vmem>>, vector<1x8x128xbf16>
      %33 = vector.shape_cast %32 : vector<1x8x128xbf16> to vector<8x128xbf16>
      %34 = vector.shape_cast %30 : vector<8x128xbf16> to vector<1x8x128xbf16>
      tpu.vector_store %arg7[%c0_16, %c0_17, %31], %34 {strides = array<i32>} : memref<1x8x256xbf16, #tpu.memory_space<vmem>>, vector<1x8x128xbf16>,
    } else {
    }
    %c1_i32_14 = arith.constant 1 : i32
    %27 = arith.cmpi eq, %arg1, %c1_i32_14 : i32
    %28 = arith.extui %27 : i1 to i32
    %c0_i32_15 = arith.constant 0 : i32
    %29 = arith.cmpi ne, %28, %c0_i32_15 : i32
    scf.if %29 {
      %c0_16 = arith.constant 0 : index
      %c0_17 = arith.constant 0 : index
      %30 = vector.load %arg8[%c0_16, %c0_17] : memref<8x1xf32, #tpu.memory_space<vmem>>, vector<8x1xf32>
      %cst_18 = arith.constant 3.906250e-03 : f32
      %31 = vector.broadcast %cst_18 : f32 to vector<8x1xf32>
      %32 = arith.mulf %30, %31 : vector<8x1xf32>
      %c0_19 = arith.constant 0 : index
      %c0_20 = arith.constant 0 : index
      %33 = vector.load %arg5[%c0_19, %c0_20] : memref<8x8xf32, #tpu.memory_space<vmem>>, vector<8x8xf32>
      %34 = vector.broadcast %32 : vector<8x1xf32> to vector<8x8xf32>
      %35 = arith.mulf %33, %34 : vector<8x8xf32>
      %cst_21 = arith.constant dense<0.000000e+00> : vector<8xf32>
      %36 = vector.multi_reduction <add>, %35, %cst_21 [0] : vector<8x8xf32> to vector<8xf32>
      %37 = vector.shape_cast %36 : vector<8xf32> to vector<1x8xf32>
      %cst_22 = arith.constant 0.000000e+00 : f32
      %38 = vector.broadcast %cst_22 : f32 to vector<1x8xf32>
      %39 = arith.maximumf %37, %38 : vector<1x8xf32>
      %c0_23 = arith.constant 0 : index
      %c0_24 = arith.constant 0 : index
      %40 = vector.load %arg6[%c0_23, %c0_24] : memref<8x8xf32, #tpu.memory_space<vmem>>, vector<8x8xf32>
      %41 = vector.broadcast %39 : vector<1x8xf32> to vector<8x8xf32>
      %42 = arith.mulf %40, %41 : vector<8x8xf32>
      %cst_25 = arith.constant dense<0.000000e+00> : vector<8xf32>
      %43 = vector.multi_reduction <add>, %42, %cst_25 [1] : vector<8x8xf32> to vector<8xf32>
      %44 = vector.shape_cast %43 : vector<8xf32> to vector<8x1xf32>
      %45 = arith.negf %44 : vector<8x1xf32>
      %46 = math.exp %45 : vector<8x1xf32>
      %cst_26 = arith.constant 1.000000e+00 : f32
      %47 = vector.broadcast %cst_26 : f32 to vector<8x1xf32>
      %48 = arith.addf %47, %46 : vector<8x1xf32>
      %49 = arith.divf %47, %48 : vector<8x1xf32>
      %50 = vector.broadcast %49 : vector<8x1xf32> to vector<8x128xf32>
      %51 = arith.mulf %16, %50 : vector<8x128xf32>
      %52 = arith.truncf %51 : vector<8x128xf32> to vector<8x128xbf16>
      %c0_27 = arith.constant 0 : index
      %c0_28 = arith.constant 0 : index
      %53 = arith.index_cast %23 : i32 to index
      %54 = vector.load %arg7[%c0_27, %c0_28, %53] : memref<1x8x256xbf16, #tpu.memory_space<vmem>>, vector<1x8x128xbf16>
      %55 = vector.shape_cast %54 : vector<1x8x128xbf16> to vector<8x128xbf16>
      %56 = vector.shape_cast %52 : vector<8x128xbf16> to vector<1x8x128xbf16>
      tpu.vector_store %arg7[%c0_27, %c0_28, %53], %56 {strides = array<i32>} : memref<1x8x256xbf16, #tpu.memory_space<vmem>>, vector<1x8x128xbf16>,
      %c0_29 = arith.constant 0 : index
      %c0_30 = arith.constant 0 : index
      %c0_31 = arith.constant 0 : index
      %57 = vector.load %arg7[%c0_29, %c0_30, %c0_31] : memref<1x8x256xbf16, #tpu.memory_space<vmem>>, vector<1x8x128xbf16>
      %58 = vector.shape_cast %57 : vector<1x8x128xbf16> to vector<8x128xbf16>
      %59 = arith.extf %58 : vector<8x128xbf16> to vector<8x128xf32>
      %60 = vector.broadcast %49 : vector<8x1xf32> to vector<8x128xf32>
      %61 = arith.mulf %59, %60 : vector<8x128xf32>
      %62 = arith.truncf %61 : vector<8x128xf32> to vector<8x128xbf16>
      %c0_32 = arith.constant 0 : index
      %c0_33 = arith.constant 0 : index
      %c0_34 = arith.constant 0 : index
      %63 = vector.load %arg7[%c0_32, %c0_33, %c0_34] : memref<1x8x256xbf16, #tpu.memory_space<vmem>>, vector<1x8x128xbf16>
      %64 = vector.shape_cast %63 : vector<1x8x128xbf16> to vector<8x128xbf16>
      %65 = vector.shape_cast %62 : vector<8x128xbf16> to vector<1x8x128xbf16>
      tpu.vector_store %arg7[%c0_32, %c0_33, %c0_34], %65 {strides = array<i32>} : memref<1x8x256xbf16, #tpu.memory_space<vmem>>, vector<1x8x128xbf16>,
    } else {
    }
    return
  }
  func.func @transform_0(%arg0: i32, %arg1: i32) -> (i32, i32, i32) {
    %c0_i32 = arith.constant 0 : i32
    %c0_i32_0 = arith.constant 0 : i32
    return %arg0, %c0_i32, %arg1 : i32, i32, i32
  }
  func.func @transform_1(%arg0: i32, %arg1: i32) -> (i32, i32) {
    %c0_i32 = arith.constant 0 : i32
    %c0_i32_0 = arith.constant 0 : i32
    %c0_i32_1 = arith.constant 0 : i32
    return %c0_i32, %c0_i32_0 : i32, i32
  }
  func.func @transform_2(%arg0: i32, %arg1: i32) -> (i32, i32) {
    %c0_i32 = arith.constant 0 : i32
    %c0_i32_0 = arith.constant 0 : i32
    %c0_i32_1 = arith.constant 0 : i32
    return %c0_i32, %c0_i32_0 : i32, i32
  }
  func.func @transform_3(%arg0: i32, %arg1: i32) -> (i32, i32) {
    %c0_i32 = arith.constant 0 : i32
    %c0_i32_0 = arith.constant 0 : i32
    %c0_i32_1 = arith.constant 0 : i32
    return %c0_i32, %c0_i32_0 : i32, i32
  }
  func.func @transform_4(%arg0: i32, %arg1: i32) -> (i32, i32) {
    %c0_i32 = arith.constant 0 : i32
    %c0_i32_0 = arith.constant 0 : i32
    %c0_i32_1 = arith.constant 0 : i32
    return %c0_i32, %c0_i32_0 : i32, i32
  }
  func.func @transform_5(%arg0: i32, %arg1: i32) -> (i32, i32, i32) {
    %c0_i32 = arith.constant 0 : i32
    %c0_i32_0 = arith.constant 0 : i32
    %c0_i32_1 = arith.constant 0 : i32
    return %arg0, %c0_i32, %c0_i32_0 : i32, i32, i32
  }
}

</mosaic_0001>

<bundles_post_ra>
// kernel: tpu_custom_call.1
= control target key start
LH: loop header
LB: loop body
LE: loop exit
PB: predicated region body
PF: predicated region fallthrough
CT: control target
= control target key end

     0   :  { %s1039_s0 = inlined_call_operand.hbm [shape: f32[2,4,256], index: 0, kind: input, shape index: {}]   ;;  %s1040_s1 = inlined_call_operand.vmem [shape: bf16[8,4], index: 1, kind: input, shape index: {}]   ;;  %s1041_s2 = inlined_call_operand.vmem [shape: f32[8,1], index: 2, kind: input, shape index: {}]   ;;  %s1042_s3 = inlined_call_operand.vmem [shape: f32[8,8], index: 3, kind: input, shape index: {}]   ;;  %s1043_s4 = inlined_call_operand.vmem [shape: f32[8,8], index: 4, kind: input, shape index: {}]   ;;  %s1044_s5 = inlined_call_operand.hbm [shape: bf16[2,8,256], index: 5, kind: output, shape index: {}]  }
   0x1   :  { %1048 = sst [smem:[#allocation13_spill]] %s1044_s5 }
   0x2   :  { %10 = vsyncpa [#allocation4], 0 }
   0x3   :  { %12 = vsyncpa [#allocation4 + $0x1], 0 }
   0x4   :  { %13 = vsyncpa [#allocation5], 0 }
   0x5   :  { %15 = vsyncpa [#allocation5 + $0x1], 0  ;;  %s828_s18 = smov 0   ;;  %s830_s19 = smov 0  }
   0x6   :  { %s832_s20 = smov 0   ;;  %s834_s21 = smov 0  }
   0x7   :  { %s836_s22 = smov 0   ;;  %s838_s23 = smov 0  }
   0x8   :  { %s840_s24 = smov 0   ;;  %s842_s25 = smov 0  }
   0x9   :  { %s844_s26 = smov 0   ;;  %s846_s27 = smov 0  }
   0xa   :  { %s848_s28 = smov 0  }
   0xb LB: > { %s491_s29 = sadd.s32 4294967295, %s789_s28   ;;  %s492_s30 = sadd.s32 4294967294, %s789_s28   ;;  %s789_s28 = sphi %s848_s28, %s21_s28   ;;  %s785_s27 = sphi %s846_s27, %s1073_s27   ;;  %s781_s26 = sphi %s844_s26, %s1072_s26   ;;  %s777_s25 = sphi %s842_s25, %s1071_s25   ;;  %s773_s24 = sphi %s840_s24, %s1070_s24   ;;  %s769_s23 = sphi %s838_s23, %s1069_s23   ;;  %s765_s22 = sphi %s836_s22, %s1068_s22   ;;  %s761_s21 = sphi %s834_s21, %s1067_s21   ;;  %s757_s20 = sphi %s832_s20, %s1066_s20   ;;  %s753_s19 = sphi %s830_s19, %s1065_s19   ;;  %s749_s18 = sphi %s828_s18, %s1064_s18  }
   0xc   : > { %s30_s6 = sadd.s32 1, %s781_s26  ;;  %s33_s7 = sadd.s32 1, %s785_s27 }
   0xd   : > { %p31_p0 = scmp.ge.s32.totalorder %s30_s6, 2  ;;  %s42_s8 = sadd.s32 1, %s769_s23 }
   0xe   : > { %p49_p1 = scmp.ne.s32.totalorder %s769_s23, %s765_s22  ;;  %p50_p2 = scmp.eq.s32.totalorder %s789_s28, 0 }
   0xf   : > { %s1075_s6 = smov (%p31_p0, %s30_s6), 0  ;;  %s1077_s7 = smov (!%p31_p0, %s33_s7), %s785_s27 }
  0x10   : > { %1049 = sst [smem:[#allocation9_spill]] %s1075_s6  ;;  %s38_s9 = ssub.s32 %s781_s26, %s1075_s6 }
  0x11   : > { %p894_p3 = por %p50_p2, %p49_p1  ;;  %p35_p4 = scmp.ge.s32.totalorder %s1077_s7, 2 }
  0x12   : > { %p55_p5 = scmp.ne.s32.totalorder %s765_s22, %s761_s21  ;;  %p56_p6 = scmp.eq.s32.totalorder %s491_s29, 0 }
  0x13   : > { %s152_s11 = sadd.s32 1, %s757_s20  ;;  %s1079_s7 = smov (%p35_p4, %s1077_s7), 0 }
  0x14   : > { %1051 = sst [smem:[#allocation10_spill]] %s1079_s7  ;;  %p902_p7 = por %p56_p6, %p55_p5 }
  0x15   : > { %p162_p8 = scmp.ne.s32.totalorder %s757_s20, %s753_s19  ;;  %s37_s13 = ssub.s32 %s785_s27, %s1079_s7 }
  0x16   : > { %p163_p9 = scmp.eq.s32.totalorder %s491_s29, 3  ;;  %s39_s14 = sor.u32 %s38_s9, %s37_s13 }
  0x17   : > { %p150_p10 = scmp.eq.s32.totalorder %s37_s13, 0  ;;  %p40_p11 = scmp.eq.s32.totalorder %s39_s14, 0 }
  0x18   : > { %p910_p12 = por %p163_p9, %p162_p8  ;;  %p168_p13 = scmp.ne.s32.totalorder %s753_s19, %s749_s18 }
  0x19   : > { %s915_s16 = scalar_select %p150_p10, %s757_s20, %s152_s11  }
  0x1a   : > { %s918_s17 = scalar_select %p40_p11, %s769_s23, %s42_s8  }
  0x1b   : > { %1054 = sst [smem:[#allocation11_spill]] %s915_s16  ;;  %p169_p0 = scmp.eq.s32.totalorder %s492_s30, 3 }
  0x1c   : > { %1055 = sst [smem:[#allocation12_spill]] %s918_s17  ;;  %p536_p1 = scmp.lt.s32.totalorder %s789_s28, 4 }
  0x1d   : > { %p923_p2 = por %p169_p0, %p168_p13  ;;  %s201_s29 = sand.u32 1, %s769_s23  }
  0x1e   : > { %s495_s9 = sshll.u32 %s201_s29, 2  ;;  %s496_s13 = sshll.u32 %s785_s27, 1 }
  0x1f   : > { %s1056_s21 = scalar_select %p923_p2, 1, 0 }
  0x20   : > { %s210_s14 = sadd.s32 %s781_s26, %s496_s13  ;;  %s205_s7 = scalar_lea.vmem [#allocation3], %s495_s9 }
  0x21   : > { %s214_s6 = sshll.u32 %s205_s7, 4  ;;  %s497_s5 = sshll.u32 %s210_s14, 6  ;;  %s215_s6 = int_to_ptr.vmem [resolvable:$true] %s214_s6 }
  0x22   : > { %s212_s8 = scalar_lea.hbm %s1039_s0, %s497_s5  ;;  %p935_p4 = pnand %p536_p1, %p894_p3 }
  0x23   : > { %p498_p5 = scmp.ge.s32.totalorder %s789_s28, 1  ;;  %p219_p6 = scmp.lt.s32.totalorder %s789_s28, 5 }
  0x24   : > { %s202_s17 = scalar_lea.sflag [#allocation4], %s201_s29  ;;  %p643_p8 = pneg %p935_p4 }
  0x25   : > { %s654_s13 = scalar_lea.vmem %s215_s6, 64  ;;  %s791_s7 = smov [#allocation3]  }
  0x26   : > { %p655_p9 = scmp.ne.s32.totalorder %s215_s6, %s654_s13  ;;  %s659_s9 = sshll.u32 %s791_s7, 4  ;;  %s660_s9 = int_to_ptr.vmem [resolvable:$false] %s659_s9 }
  0x27   : > { %s661_s16 = scalar_lea.vmem %s660_s9, 128  ;;  %p662_p13 = scmp.lt.s32.totalorder %s215_s6, %s660_s9 }
  0x28   : > { %p657_p10 = pnand %p655_p9, %p643_p8  ;;  %p663_p0 = scmp.lt.s32.totalorder %s661_s16, %s654_s13 }
  0x2a   : > { %p658_p11 = pneg %p657_p10  ;;  %p664_p3 = por %p663_p0, %p662_p13 }
  0x2c   : > { %p665_p1 = pnand %p664_p3, %p658_p11 }
  0x2e   : > { %668 = shalt.err (!%p665_p1)
}
  0x2f   : > { %531 = dma.hbm_to_vmem [thread:$0]  (!%p935_p4), %s212_s8, 64, %s215_s6, %s202_s17  }
  0x30   : > { %p220_p2 = pnand %p498_p5, %p219_p6 }
  0x31   : > { %s225_s5 = sand.u32 (!%p220_p2), 1, %s765_s22  }
  0x32   : > { %223 = sbr.rel (%p220_p2) target bundleno = 811 (0x32b), region = 40  ;;  %s499_s10 = sshll.u32 (!%p220_p2), %s225_s5, 2 }
  0x33   : > { %s226_s29 = scalar_lea.sflag (!%p220_p2), [#allocation4], %s225_s5  ;;  %s229_s14 = scalar_lea.vmem (!%p220_p2), [#allocation3], %s499_s10 }
  0x37   : > { %740 = dma.done.wait (%p902_p7), %s226_s29, 64  }
  0x38   : > { %742 = vsyncadd (%p902_p7), %s226_s29, 4294967232  ;;  %s253_s11 = sand.u32 1, %s753_s19   ;;  %p501_p2 = scmp.ne.s32.totalorder %s773_s24, 0 }
  0x39   : > { %s500_s6 = sshll.u32 %s253_s11, 3 }
  0x3a   : > { %s957_s17 = scalar_lea.vmem [#allocation6], %s500_s6  ;;  %260 = sbr.rel (%p501_p2) target bundleno = 65 (0x41), region = 48 }
  0x3f   : > { %vm261_vm0 = vcmask 7168   ;;  %v792_v0 = vmov 0.0  }
  0x40   : > { %262 = vst.msk [vmem:[#allocation2] sm:$0xff] %vm261_vm0, %v792_v0 }
  0x41 PF: > { %v263_v1 = vld [vmem:[%s229_s14] sm:$0xf]  ;;  %vm276_vm1 = vcmask 1041408   ;;  %v793_v2 = vmov 0.0   ;;  %vm794_vm2 = vmmov 0   ;;  %v266_v4 = vld [vmem:[%s1041_s2] sm:$0xff] }
  0x42   : > { %518 = vmatprep.subr.bf16.mxu0 %v793_v2  ;;  %v264_v3 = vpack.c.bf16 %v263_v1, %v263_v1  ;;  %520 = vmatprep.mubr.msk.bf16.mxu0 %vm794_vm2, %v793_v2  ;;  %v795_v5 = vmov 0   ;;  %v265_v7 = vld [vmem:[%s1040_s1] sm:$0xf]  ;;  %vm272_vm3 = vcmask 31744   ;;  %s504_s7 = sshll.u32 %s773_s24, 7  ;;  %vm331_vm4 = vcmask 7168  }
  0x43   : > { %631 = vset.pattern.permute.xlu0 %v795_v5  ;;  %p505_p7 = scmp.ge.s32.totalorder %s773_s24, 1 }
  0x44   : > { %v278_v6 = vsel %vm276_vm1, %v264_v3, 0  ;;  %269 = vperm.xlu0 %631, %v266_v4   ;;  %s339_s9 = sshra.s32 (!%p505_p7), %s504_s7, 7 }
  0x45   : > { %519 = vmatpush3.bf16.msra.mxu0 %v278_v6  ;;  %s506_s16 = sshll.u32 (!%p505_p7), %s339_s9, 2 }
  0x46   : > { %s342_s5 = scalar_lea.vmem (!%p505_p7), %s957_s17, %s506_s16 [#allocation6] }
  0x47   : > { %v327_v19 = vld [vmem:[#allocation2] sm:$0xff] }
  0x48   : > { %521 = vmatmul.mubr.msk.bf16.vlgmr.msra.gmra.mxu0 %vm272_vm3, %v265_v7 }
  0xbf   : > { %v270_v8 = vpop.permute.xlu0 %269 }
 0x108   : > { %v314_v9 = vpop.f32.mrf.mxu0 }
 0x109   : > { %v315_v10 = vadd.f32 %v314_v9, %v270_v8 }
 0x10a   : > { %v522_v11 = vpop.f32.mrf.mxu0 }
 0x10b   : > { %v503_v12 = vmul.f32 -1.442695, %v315_v10 }
 0x10c   : > { %v317_v13 = vpop.f32.mrf.mxu0 }
 0x10d   : > { %632 = vpow2.f32 %v503_v12 }
 0x10e   : > { %v523_v14 = vpop.f32.mrf.mxu0 }
 0x11a   : > { %v633_v15 = vpop.eup %632 }
 0x11b   : > { %v323_v16 = vadd.f32 1.0, %v633_v15 }
 0x11d   : > { %634 = vrcp.f32 %v323_v16 }
 0x12a   : > { %v635_v17 = vpop.eup %634 }
 0x12b   : > { %v326_v18 = vmul.f32 %v635_v17, %v315_v10 }
 0x12d   : > { %328 = vadd.xlane.f32.xlu0 %v326_v18 }
 0x1b5   : > { %337 = sbr.rel (%p505_p7) target bundleno = 445 (0x1bd), region = 52 }
 0x1b6   : > { %v329_v20 = vpop.xlane.xlu0 %328 }
 0x1b7   : > { %v330_v21 = vadd.f32 %v329_v20, %v327_v19 }
 0x1b9   : > { %332 = vst.msk [vmem:[#allocation2] sm:$0xff] %vm331_vm4, %v330_v21 }
 0x1ba   : > { %v338_v22 = vpack.c.bf16 %v326_v18, %v326_v18 }
 0x1bc   : > { %343 = vst [vmem:[%s342_s5] sm:$0xf] %v338_v22 }
 0x1bd PF: > { %p507_p4 = scmp.ne.s32.totalorder %s773_s24, 1 }
 0x1be   : > { %s379_s12 = sshra.s32 (!%p507_p4), %s504_s7, 7 }
 0x1bf   : > { %347 = sbr.rel (%p507_p4) target bundleno = 788 (0x314), region = 56  ;;  %s509_s8 = sshll.u32 (!%p507_p4), %s379_s12, 2 }
 0x1c0   : > { %s382_s30 = scalar_lea.vmem (!%p507_p4), %s957_s17, %s509_s8 [#allocation6] }
 0x1c4   : > { %v348_v23 = vld [vmem:[#allocation2] sm:$0xff]  ;;  %v796_v24 = vmov 0   ;;  %vm357_vm5 = vcmask 64512  }
 0x1c5   : > { %636 = vset.pattern.permute.xlu0 %v796_v24  ;;  %v349_v25 = vmul.f32 0.00390625, %v348_v23  ;;  %v350_v26 = vld [vmem:[%s1042_s3] sm:$0xff] }
 0x1c6   : > { %v366_v36 = vld [vmem:[%s1043_s4] sm:$0xff] }
 0x1c7   : > { %353 = vperm.xlu0 %636, %v349_v25  }
 0x242   : > { %v354_v27 = vpop.permute.xlu0 %353 }
 0x243   : > { %v356_v28 = vmul.f32 %v354_v27, %v350_v26 }
 0x245   : > { %v358_v29 = vsel %vm357_vm5, %v356_v28, 0.0 }
 0x246   : > { %v359_v30 = vrot.slane %v358_v29, 4 }
 0x248   : > { %v360_v31 = vadd.f32 %v359_v30, %v358_v29 }
 0x24a   : > { %v361_v32 = vrot.slane %v360_v31, 2 }
 0x24c   : > { %v362_v33 = vadd.f32 %v361_v32, %v360_v31 }
 0x24e   : > { %v363_v34 = vrot.slane %v362_v33, 1 }
 0x250   : > { %v364_v35 = vadd.f32 %v363_v34, %v362_v33 }
 0x252   : > { %v365_v37 = vmax.f32 %v364_v35, 0.0 }
 0x254   : > { %v367_v38 = vmul.f32 %v366_v36, %v365_v37 }
 0x256   : > { %v368_v39 = vsel %vm357_vm5, %v367_v38, 0.0 }
 0x257   : > { %369 = vadd.xlane.f32.xlu0 %v368_v39 }
 0x2e0   : > { %v370_v40 = vpop.xlane.xlu0 %369 }
 0x2e1   : > { %v508_v41 = vmul.f32 -1.442695, %v370_v40 }
 0x2e3   : > { %637 = vpow2.f32 %v508_v41 }
 0x2f0   : > { %v638_v42 = vpop.eup %637 }
 0x2f1   : > { %v374_v43 = vadd.f32 1.0, %v638_v42 }
 0x2f3   : > { %639 = vrcp.f32 %v374_v43 }
 0x300   : > { %v640_v44 = vpop.eup %639 }
 0x301   : > { %v377_v45 = vmul.f32 %v640_v44, %v326_v18 }
 0x303   : > { %v378_v46 = vpack.c.bf16 %v377_v45, %v377_v45 }
 0x305   : > { %383 = vst [vmem:[%s382_s30] sm:$0xf] %v378_v46 }
 0x30c   : > { %v384_v47 = vld [vmem:[%s957_s17] sm:$0xf] }
 0x30d   : > { %v385_v48 = vunpack.c.l.bf16 %v384_v47 }
 0x30f   : > { %v386_v49 = vmul.f32 %v640_v44, %v385_v48 }
 0x311   : > { %v387_v50 = vpack.c.bf16 %v386_v49, %v386_v49 }
 0x313   : > { %388 = vst [vmem:[%s957_s17] sm:$0xf] %v387_v50 }
 0x314 PF: > { %s515_s13 = sshll.u32 %s777_s25, 7  ;;  %s1058_s7 = sld [smem:[#allocation13_spill]] }
 0x315   : > { %s404_s5 = sshll.u32 %s957_s17, 4  ;;  %s390_s10 = scalar_lea.sflag [#allocation5], %s253_s11  ;;  %s405_s5 = int_to_ptr.vmem [resolvable:$true] %s404_s5 }
 0x316   : > { %s669_s29 = scalar_lea.vmem %s405_s5, 128  ;;  %s797_s14 = smov [#allocation6]  }
 0x317   : > { %p670_p5 = scmp.ne.s32.totalorder %s405_s5, %s669_s29  ;;  %s673_s6 = sshll.u32 %s797_s14, 4  ;;  %s674_s6 = int_to_ptr.vmem [resolvable:$false] %s673_s6 }
 0x318   : > { %s675_s12 = scalar_lea.vmem %s674_s6, 256  ;;  %p676_p9 = scmp.lt.s32.totalorder %s405_s5, %s674_s6 }
 0x319   : > { %p671_p6 = pnand %p670_p5, %p910_p12  ;;  %p677_p10 = scmp.lt.s32.totalorder %s675_s12, %s669_s29 }
 0x31a   : > { %s402_s16 = scalar_lea.hbm %s1058_s7, %s515_s13 }
 0x31b   : > { %p672_p8 = pneg %p671_p6  ;;  %p678_p11 = por %p677_p10, %p676_p9 }
 0x31d   : > { %p679_p13 = pnand %p678_p11, %p672_p8 }
 0x31f   : > { %682 = shalt.err (!%p679_p13)
}
 0x320   : > { %s683_s25 = scalar_lea.hbm %s402_s16, 128  ;;  %s687_s8 = scalar_lea.hbm %s1058_s7, 256 }
 0x321   : > { %p684_p0 = scmp.ne.s32.totalorder %s402_s16, %s683_s25  ;;  %p688_p2 = scmp.lt.s32.totalorder %s402_s16, %s1058_s7 }
 0x322   : > { %p689_p7 = scmp.lt.s32.totalorder %s687_s8, %s683_s25 }
 0x323   : > { %p685_p3 = pnand %p684_p0, %p910_p12 }
 0x324   : > { %p690_p4 = por %p689_p7, %p688_p2 }
 0x325   : > { %p686_p1 = pneg %p685_p3 }
 0x327   : > { %p691_p5 = pnand %p690_p4, %p686_p1 }
 0x329   : > { %694 = shalt.err (!%p691_p5)
}
 0x32a   : > { %526 = dma.vmem_to_hbm [thread:$0]  (%p910_p12), %s405_s5, 128, %s402_s16, %s390_s10  }
 0x32b PF: > { %p537_p6 = scmp.ge.s32.totalorder %s789_s28, 2  ;;  %s416_s9 = sand.u32 1, %s749_s18  }
 0x32c   : > { %p1059_p8 = scmp.ne.s32.totalorder %s1056_s21, 0  ;;  %s417_s24 = scalar_lea.sflag [#allocation5], %s416_s9 }
 0x32e   : > { %p533_p9 = pnand %p537_p6, %p1059_p8 }
 0x330   : > { %p534_p10 = pneg %p533_p9 }
 0x332   : > { %744 = dma.done.wait (%p534_p10), %s417_s24, 128  }
 0x333   : > { %746 = vsyncadd (%p534_p10), %s417_s24, 4294967168  ;;  %s21_s28 = sadd.s32 1, %s789_s28   ;;  %s1060_s29 = sld [smem:[#allocation11_spill]] }
 0x334   : > { %p18_p11 = scmp.ge.s32.totalorder %s21_s28, 6   ;;  %s1061_s15 = sld [smem:[#allocation12_spill]] }
 0x335   : > { %s1062_s16 = sld [smem:[#allocation9_spill]]  ;;  %s1064_s18 = smov %s753_s19 }
 0x336   : > { %s1063_s5 = sld [smem:[#allocation10_spill]]  ;;  %s1065_s19 = smov %s757_s20 }
 0x337   : > { %s1067_s21 = smov %s765_s22  ;;  %s1068_s22 = smov %s769_s23 }
 0x338   : > { %s1070_s24 = smov %s781_s26  ;;  %s1071_s25 = smov %s785_s27 }
 0x339   : > { %s1066_s20 = smov %s1060_s29  ;;  %20 = sbr.rel (!%p18_p11) target bundleno = 11 (0xb), region = 99 }
 0x33a   : > { %s1069_s23 = smov %s1061_s15 }
 0x33b   : > { %s1072_s26 = smov %s1062_s16 }
 0x33c   : > { %s1073_s27 = smov %s1063_s5 }
 0x33e   :  { %422 = vsyncpa [#allocation4], 1 }
 0x33f   :  { %424 = vsyncpa [#allocation4 + $0x1], 1 }
 0x340   :  { %425 = vsyncpa [#allocation5], 1 }
 0x341   :  { %427 = vsyncpa [#allocation5 + $0x1], 1 }

</bundles_post_ra>
